<compile_context>
chip_gen: v5e
topology: v5e:2x2
jax: 0.10.0
libtpu: 0.0.40
codegen_flags: <defaults>
</compile_context>

<pallas_src>
import functools
import math

import jax
import jax.numpy as jnp
from jax.experimental import pallas as pl
from jax.experimental.pallas import tpu as pltpu


def _round_up(n, m):
    return ((n + m - 1) // m) * m


def _encoder_mlp_kernel_xy(x_ref, y_ref, w1x_ref, w1y_ref, b1_ref,
                           w2_ref, b2_ref, out_ref):
    """Fused [x|y] @ W1 + b1 -> ReLU -> @ W2 + b2, lane-dense output."""
    # Fused concat: [x | y] @ W1  ==  x @ W1[:dx] + y @ W1[dx:]
    h = jnp.dot(x_ref[...], w1x_ref[...], preferred_element_type=jnp.float32)
    h = h + jnp.dot(y_ref[...], w1y_ref[...], preferred_element_type=jnp.float32)
    h = jnp.maximum(h + b1_ref[...], 0.0)                       # bias + ReLU in f32
    out = jnp.dot(h.astype(w2_ref.dtype), w2_ref[...],
                  preferred_element_type=jnp.float32) + b2_ref[...]
    out_ref[...] = out.astype(out_ref.dtype)


def _encoder_mlp_kernel_y(y_ref, w1_ref, b1_ref, w2_ref, b2_ref, out_ref):
    """Same as above but without the x path (x has zero features)."""
    h = jnp.dot(y_ref[...], w1_ref[...], preferred_element_type=jnp.float32)
    h = jnp.maximum(h + b1_ref[...], 0.0)
    out = jnp.dot(h.astype(w2_ref.dtype), w2_ref[...],
                  preferred_element_type=jnp.float32) + b2_ref[...]
    out_ref[...] = out.astype(out_ref.dtype)


def encoder_forward(x, y, params, z_space_size, *,
                    block_b=128, compute_dtype=jnp.float32):
    """Mirrors Encoder.forward: concat flattened x & y, run MLP, split output."""
    w1, b1, w2, b2 = params
    B = y.shape[0]
    y_flat = y.reshape(B, -1)

    # PyTorch checks x_pt.shape[1] > 0; also require a nonzero flattened width
    # (channels > 0 with zero spatial extent would be a zero-width concat).
    dx = math.prod(x.shape[1:]) if x.ndim > 1 else 0
    use_x = (x.ndim > 1 and x.shape[1] > 0 and dx > 0)
    x_flat = x.reshape(B, -1) if use_x else None
    if not use_x:
        dx = 0
    dy = y_flat.shape[1]

    in_features, hidden = w1.shape
    out_features = w2.shape[1]                     # == 2 * z_space_size
    assert out_features == 2 * z_space_size
    assert in_features == (dx + dy if use_x else dy)

    # ---------------- layout padding (pure zero-padding) -------------------
    lane = 128
    h_pad = _round_up(hidden, lane)
    o_pad = _round_up(out_features, lane)
    tb = min(block_b, _round_up(B, 8))             # batch tile, multiple of 8 (f32)
    b_pad = _round_up(B, tb)

    w1p = jnp.pad(w1, ((0, 0), (0, h_pad - hidden))).astype(compute_dtype)
    b1p = jnp.pad(b1.reshape(1, -1), ((0, 0), (0, h_pad - hidden))).astype(jnp.float32)
    w2p = jnp.pad(w2, ((0, h_pad - hidden), (0, o_pad - out_features))).astype(compute_dtype)
    b2p = jnp.pad(b2.reshape(1, -1), ((0, 0), (0, o_pad - out_features))).astype(jnp.float32)
    y_in = jnp.pad(y_flat, ((0, b_pad - B), (0, 0))).astype(compute_dtype)

    grid = (b_pad // tb,)
    batch_map = lambda i: (i, 0)
    const_map = lambda i: (0, 0)                   # weights stay VMEM-resident

    out_shape = jax.ShapeDtypeStruct((b_pad, o_pad), jnp.float32)
    out_spec = pl.BlockSpec((tb, o_pad), batch_map)

    itemsize = jnp.dtype(compute_dtype).itemsize
    flops = 2 * b_pad * (in_features * h_pad + h_pad * o_pad)
    bytes_accessed = (b_pad * (dx + dy) * itemsize
                      + (in_features * h_pad + h_pad * o_pad) * itemsize
                      + (h_pad + o_pad) * 4
                      + b_pad * o_pad * 4)
    cost = pl.CostEstimate(flops=flops, transcendentals=0,
                           bytes_accessed=bytes_accessed)
    compiler_params = pltpu.CompilerParams(dimension_semantics=("parallel",))

    if use_x:
        x_in = jnp.pad(x_flat, ((0, b_pad - B), (0, 0))).astype(compute_dtype)
        w1x = w1p[:dx]                             # split of W1 for the fused concat
        w1y = w1p[dx:]
        out = pl.pallas_call(
            _encoder_mlp_kernel_xy,
            out_shape=out_shape,
            grid=grid,
            in_specs=[
                pl.BlockSpec((tb, dx), batch_map),
                pl.BlockSpec((tb, dy), batch_map),
                pl.BlockSpec((dx, h_pad), const_map),
                pl.BlockSpec((dy, h_pad), const_map),
                pl.BlockSpec((1, h_pad), const_map),
                pl.BlockSpec((h_pad, o_pad), const_map),
                pl.BlockSpec((1, o_pad), const_map),
            ],
            out_specs=out_spec,
            compiler_params=compiler_params,
            cost_estimate=cost,
        )(x_in, y_in, w1x, w1y, b1p, w2p, b2p)
    else:
        out = pl.pallas_call(
            _encoder_mlp_kernel_y,
            out_shape=out_shape,
            grid=grid,
            in_specs=[
                pl.BlockSpec((tb, dy), batch_map),
                pl.BlockSpec((dy, h_pad), const_map),
                pl.BlockSpec((1, h_pad), const_map),
                pl.BlockSpec((h_pad, o_pad), const_map),
                pl.BlockSpec((1, o_pad), const_map),
            ],
            out_specs=out_spec,
            compiler_params=compiler_params,
            cost_estimate=cost,
        )(y_in, w1p, b1p, w2p, b2p)

    # Un-pad batch and split mean / log_var in the wrapper (lane-dense kernel
    # stores; the slice out here is free layout plumbing).
    out = out[:B, :out_features]
    mean = out[:, :z_space_size]
    log_var = out[:, z_space_size:]
    return mean, log_var


def init_params(key, in_features, hidden, z_space_size):
    """Deterministic synthetic parameters for the MLP built by layers_builder."""
    k1, k2, k3, k4 = jax.random.split(key, 4)
    w1 = jax.random.normal(k1, (in_features, hidden), jnp.float32) * 0.05
    b1 = jax.random.normal(k2, (1, hidden), jnp.float32) * 0.05
    w2 = jax.random.normal(k3, (hidden, 2 * z_space_size), jnp.float32) * 0.05
    b2 = jax.random.normal(k4, (1, 2 * z_space_size), jnp.float32) * 0.05
    return (w1, b1, w2, b2)


if __name__ == "__main__":
    key = jax.random.PRNGKey(0)
    kx, ky, kp = jax.random.split(key, 3)

    # Small shapes consistent with the module's forward:
    #   x: [B, x_space_size], y: [B, y_space_size]
    B = 2
    x_space_size = 4
    y_space_size = 16
    z_space_size = 8
    hidden = 32

    x = jax.random.normal(kx, (B, x_space_size), jnp.float32)
    y = jax.random.normal(ky, (B, y_space_size), jnp.float32)
    params = init_params(kp, x_space_size + y_space_size, hidden, z_space_size)

    fwd = jax.jit(functools.partial(encoder_forward, z_space_size=z_space_size))
    mean, log_var = fwd(x, y, params)
    jax.block_until_ready((mean, log_var))

    # Pure-JAX reference check of the fused kernel.
    mixed = jnp.concatenate([x.reshape(B, -1), y.reshape(B, -1)], axis=1)
    w1, b1, w2, b2 = params
    h_ref = jnp.maximum(mixed @ w1 + b1, 0.0) @ w2 + b2
    assert jnp.allclose(mean, h_ref[:, :z_space_size], atol=1e-5)
    assert jnp.allclose(log_var, h_ref[:, z_space_size:], atol=1e-5)
    assert mean.shape == (B, z_space_size) and log_var.shape == (B, z_space_size)

    print("KERNEL_OK")
</pallas_src>

<mosaic_0001>
module attributes {stable_mosaic.version = 11 : i64} {
  func.func @_encoder_mlp_kernel_xy(%arg0: i32, %arg1: memref<8x4xf32, #tpu.memory_space<vmem>>, %arg2: memref<8x16xf32, #tpu.memory_space<vmem>>, %arg3: memref<4x128xf32, #tpu.memory_space<vmem>>, %arg4: memref<16x128xf32, #tpu.memory_space<vmem>>, %arg5: memref<1x128xf32, #tpu.memory_space<vmem>>, %arg6: memref<128x128xf32, #tpu.memory_space<vmem>>, %arg7: memref<1x128xf32, #tpu.memory_space<vmem>>, %arg8: memref<8x128xf32, #tpu.memory_space<vmem>>) attributes {dimension_semantics = [#tpu.dimension_semantics<parallel>], iteration_bounds = array<i64: 1>, scalar_prefetch = 0 : i64, scratch_operands = 0 : i64, tpu.core_type = #tpu.core_type<tc>, window_params = [{transform_indices = @transform_0, window_bounds = array<i64: 8, 4>}, {transform_indices = @transform_1, window_bounds = array<i64: 8, 16>}, {pipeline_mode = #tpu.pipeline_mode<synchronous>, transform_indices = @transform_2, window_bounds = array<i64: 4, 128>}, {pipeline_mode = #tpu.pipeline_mode<synchronous>, transform_indices = @transform_3, window_bounds = array<i64: 16, 128>}, {pipeline_mode = #tpu.pipeline_mode<synchronous>, transform_indices = @transform_4, window_bounds = array<i64: 1, 128>}, {pipeline_mode = #tpu.pipeline_mode<synchronous>, transform_indices = @transform_5, window_bounds = array<i64: 128, 128>}, {pipeline_mode = #tpu.pipeline_mode<synchronous>, transform_indices = @transform_6, window_bounds = array<i64: 1, 128>}, {transform_indices = @transform_7, window_bounds = array<i64: 8, 128>}]} {
    %c0 = arith.constant 0 : index
    %c0_0 = arith.constant 0 : index
    %0 = vector.load %arg1[%c0, %c0_0] : memref<8x4xf32, #tpu.memory_space<vmem>>, vector<8x4xf32>
    %c0_1 = arith.constant 0 : index
    %c0_2 = arith.constant 0 : index
    %1 = vector.load %arg3[%c0_1, %c0_2] : memref<4x128xf32, #tpu.memory_space<vmem>>, vector<4x128xf32>
    %cst = arith.constant dense<0.000000e+00> : vector<8x128xf32>
    %2 = tpu.matmul %0, %1, %cst {dimension_numbers = #tpu.dot_dimension_numbers<[1], [0], [0], [1], [0, 0, 1, 1], [], []>} : vector<8x4xf32>, vector<4x128xf32>, vector<8x128xf32> -> vector<8x128xf32>
    %c0_3 = arith.constant 0 : index
    %c0_4 = arith.constant 0 : index
    %3 = vector.load %arg2[%c0_3, %c0_4] : memref<8x16xf32, #tpu.memory_space<vmem>>, vector<8x16xf32>
    %c0_5 = arith.constant 0 : index
    %c0_6 = arith.constant 0 : index
    %4 = vector.load %arg4[%c0_5, %c0_6] : memref<16x128xf32, #tpu.memory_space<vmem>>, vector<16x128xf32>
    %cst_7 = arith.constant dense<0.000000e+00> : vector<8x128xf32>
    %5 = tpu.matmul %3, %4, %cst_7 {dimension_numbers = #tpu.dot_dimension_numbers<[1], [0], [0], [1], [0, 0, 1, 1], [], []>} : vector<8x16xf32>, vector<16x128xf32>, vector<8x128xf32> -> vector<8x128xf32>
    %6 = arith.addf %2, %5 : vector<8x128xf32>
    %c0_8 = arith.constant 0 : index
    %c0_9 = arith.constant 0 : index
    %7 = vector.load %arg5[%c0_8, %c0_9] : memref<1x128xf32, #tpu.memory_space<vmem>>, vector<1x128xf32>
    %8 = vector.broadcast %7 : vector<1x128xf32> to vector<8x128xf32>
    %9 = arith.addf %6, %8 : vector<8x128xf32>
    %cst_10 = arith.constant 0.000000e+00 : f32
    %10 = vector.broadcast %cst_10 : f32 to vector<8x128xf32>
    %11 = arith.maximumf %9, %10 : vector<8x128xf32>
    %c0_11 = arith.constant 0 : index
    %c0_12 = arith.constant 0 : index
    %12 = vector.load %arg6[%c0_11, %c0_12] : memref<128x128xf32, #tpu.memory_space<vmem>>, vector<128x128xf32>
    %cst_13 = arith.constant dense<0.000000e+00> : vector<8x128xf32>
    %13 = tpu.matmul %11, %12, %cst_13 {dimension_numbers = #tpu.dot_dimension_numbers<[1], [0], [0], [1], [0, 0, 1, 1], [], []>} : vector<8x128xf32>, vector<128x128xf32>, vector<8x128xf32> -> vector<8x128xf32>
    %c0_14 = arith.constant 0 : index
    %c0_15 = arith.constant 0 : index
    %14 = vector.load %arg7[%c0_14, %c0_15] : memref<1x128xf32, #tpu.memory_space<vmem>>, vector<1x128xf32>
    %15 = vector.broadcast %14 : vector<1x128xf32> to vector<8x128xf32>
    %16 = arith.addf %13, %15 : vector<8x128xf32>
    %c0_16 = arith.constant 0 : index
    %c0_17 = arith.constant 0 : index
    %17 = vector.load %arg8[%c0_16, %c0_17] : memref<8x128xf32, #tpu.memory_space<vmem>>, vector<8x128xf32>
    tpu.vector_store %arg8[%c0_16, %c0_17], %16 {strides = array<i32>} : memref<8x128xf32, #tpu.memory_space<vmem>>, vector<8x128xf32>,
    return
  }
  func.func @transform_0(%arg0: i32) -> (i32, i32) {
    %c0_i32 = arith.constant 0 : i32
    %c0_i32_0 = arith.constant 0 : i32
    return %arg0, %c0_i32 : i32, i32
  }
  func.func @transform_1(%arg0: i32) -> (i32, i32) {
    %c0_i32 = arith.constant 0 : i32
    %c0_i32_0 = arith.constant 0 : i32
    return %arg0, %c0_i32 : i32, i32
  }
  func.func @transform_2(%arg0: i32) -> (i32, i32) {
    %c0_i32 = arith.constant 0 : i32
    %c0_i32_0 = arith.constant 0 : i32
    %c0_i32_1 = arith.constant 0 : i32
    return %c0_i32, %c0_i32_0 : i32, i32
  }
  func.func @transform_3(%arg0: i32) -> (i32, i32) {
    %c0_i32 = arith.constant 0 : i32
    %c0_i32_0 = arith.constant 0 : i32
    %c0_i32_1 = arith.constant 0 : i32
    return %c0_i32, %c0_i32_0 : i32, i32
  }
  func.func @transform_4(%arg0: i32) -> (i32, i32) {
    %c0_i32 = arith.constant 0 : i32
    %c0_i32_0 = arith.constant 0 : i32
    %c0_i32_1 = arith.constant 0 : i32
    return %c0_i32, %c0_i32_0 : i32, i32
  }
  func.func @transform_5(%arg0: i32) -> (i32, i32) {
    %c0_i32 = arith.constant 0 : i32
    %c0_i32_0 = arith.constant 0 : i32
    %c0_i32_1 = arith.constant 0 : i32
    return %c0_i32, %c0_i32_0 : i32, i32
  }
  func.func @transform_6(%arg0: i32) -> (i32, i32) {
    %c0_i32 = arith.constant 0 : i32
    %c0_i32_0 = arith.constant 0 : i32
    %c0_i32_1 = arith.constant 0 : i32
    return %c0_i32, %c0_i32_0 : i32, i32
  }
  func.func @transform_7(%arg0: i32) -> (i32, i32) {
    %c0_i32 = arith.constant 0 : i32
    %c0_i32_0 = arith.constant 0 : i32
    return %arg0, %c0_i32 : i32, i32
  }
}

</mosaic_0001>

<bundles_post_ra>
// kernel: encoder_forward.1
= control target key start
LH: loop header
LB: loop body
LE: loop exit
PB: predicated region body
PF: predicated region fallthrough
CT: control target
= control target key end

     0   :  { %vm59_vm0 = vcmask 1043456   ;;  %vm55_vm1 = vcmask 31744   ;;  %vm31_vm2 = vcmask 130048   ;;  %s251_s3 = inlined_call_operand.vmem [shape: f32[16,128], index: 3, kind: input, shape index: {}]   ;;  %s252_s2 = inlined_call_operand.vmem [shape: f32[4,128], index: 2, kind: input, shape index: {}]   ;;  %s253_s1 = inlined_call_operand.vmem [shape: f32[8,16], index: 1, kind: input, shape index: {}]   ;;  %s254_s0 = inlined_call_operand.vmem [shape: f32[8,4], index: 0, kind: input, shape index: {}]   ;;  %s255_s5 = inlined_call_operand.vmem [shape: f32[128,128], index: 5, kind: input, shape index: {}]   ;;  %s256_s4 = inlined_call_operand.vmem [shape: f32[1,128], index: 4, kind: input, shape index: {}]   ;;  %s257_s6 = inlined_call_operand.vmem [shape: f32[1,128], index: 6, kind: input, shape index: {}]   ;;  %s258_s7 = inlined_call_operand.vmem [shape: f32[8,128], index: 7, kind: output, shape index: {}]  }
   0x1   :  { %v30_v0 = vld [vmem:[%s251_s3 + $0x8] sm:$0xff]  ;;  %v29_v1 = vld [vmem:[%s251_s3] sm:$0xff]  ;;  %v104_v5 = vld [vmem:[%s255_s5 + $0x78] sm:$0xff] }
   0x2   :  { %v27_v2 = vld [vmem:[%s252_s2] sm:$0xf]  ;;  %49 = vmatpush.msra.mxu0 %v30_v0  ;;  %109 = vmatpush.msra.mxu2 %v104_v5  ;;  %v103_v6 = vld [vmem:[%s255_s5 + $0x70] sm:$0xff]  ;;  %v102_v7 = vld [vmem:[%s255_s5 + $0x68] sm:$0xff] }
   0x3   :  { %135 = vmatpush.msk.msra.mxu1 %vm59_vm0, %v27_v2  ;;  %v28_v3 = vld [vmem:[%s253_s1] sm:$0xff]  ;;  %v100_v9 = vld [vmem:[%s255_s5 + $0x58] sm:$0xff]  ;;  %v99_v10 = vld [vmem:[%s255_s5 + $0x50] sm:$0xff] }
   0x4   :  { %v26_v4 = vld [vmem:[%s254_s0] sm:$0xff]  ;;  %50 = vmatpush.msra.mxu0 %v29_v1  ;;  %110 = vmatpush.msra.mxu2 %v103_v6  ;;  %v98_v11 = vld [vmem:[%s255_s5 + $0x48] sm:$0xff]  ;;  %v96_v13 = vld [vmem:[%s255_s5 + $0x38] sm:$0xff] }
   0x5   :  { %136 = vmatmul.msk.f32.vlgmr.msra.gmra.mxu1 %vm55_vm1, %v26_v4  ;;  %134 = vmatmul.msk.f32.vlgmr.msra.gmra.mxu0 %vm31_vm2, %v28_v3  ;;  %v101_v8 = vld [vmem:[%s255_s5 + $0x60] sm:$0xff]  ;;  %v95_v14 = vld [vmem:[%s255_s5 + $0x30] sm:$0xff]  ;;  %v94_v15 = vld [vmem:[%s255_s5 + $0x28] sm:$0xff] }
   0x6   :  { %111 = vmatpush.msra.mxu2 %v102_v7  ;;  %v97_v12 = vld [vmem:[%s255_s5 + $0x40] sm:$0xff]  ;;  %v92_v17 = vld [vmem:[%s255_s5 + $0x18] sm:$0xff]  ;;  %v91_v18 = vld [vmem:[%s255_s5 + $0x10] sm:$0xff] }
   0x7   :  { %v93_v16 = vld [vmem:[%s255_s5 + $0x20] sm:$0xff]  ;;  %v90_v19 = vld [vmem:[%s255_s5 + $0x8] sm:$0xff] }
   0x8   :  { %112 = vmatpush.msra.mxu2 %v101_v8  ;;  %v89_v20 = vld [vmem:[%s255_s5] sm:$0xff] }
   0x9   :  { %v137_v22 = vld [vmem:[%s256_s4] ss:$0 sm:$0xff] }
   0xa   :  { %113 = vmatpush.msra.mxu2 %v100_v9  ;;  %v138_v27 = vld [vmem:[%s257_s6] ss:$0 sm:$0xff] }
   0xc   :  { %114 = vmatpush.msra.mxu2 %v99_v10 }
   0xe   :  { %115 = vmatpush.msra.mxu2 %v98_v11 }
  0x10   :  { %116 = vmatpush.msra.mxu2 %v97_v12 }
  0x12   :  { %117 = vmatpush.msra.mxu2 %v96_v13 }
  0x14   :  { %118 = vmatpush.msra.mxu2 %v95_v14 }
  0x16   :  { %119 = vmatpush.msra.mxu2 %v94_v15 }
  0x18   :  { %120 = vmatpush.msra.mxu2 %v93_v16 }
  0x1a   :  { %121 = vmatpush.msra.mxu2 %v92_v17 }
  0x1c   :  { %122 = vmatpush.msra.mxu2 %v91_v18 }
  0x1e   :  { %123 = vmatpush.msra.mxu2 %v90_v19 }
  0x20   :  { %124 = vmatpush.msra.mxu2 %v89_v20 }
  0x82   :  { %v80_v21 = vpop.f32.mrf.mxu1  ;;  %v52_v23 = vpop.f32.mrf.mxu0 }
  0x83   :  { %v81_v24 = vadd.f32 %v80_v21, %v52_v23 }
  0x85   :  { %v87_v25 = vadd.f32 %v137_v22, %v81_v24 }
  0x87   :  { %v88_v26 = vmax.f32 %v87_v25, 0.0 }
  0x89   :  { %125 = vmatmul.f32.vlgmr.msra.gmra.mxu2 %v88_v26 }
 0x10c   :  { %v126_v28 = vpop.f32.mrf.mxu2 }
 0x10d   :  { %v127_v29 = vadd.f32 %v138_v27, %v126_v28 }
 0x10f   :  { %129 = vst [vmem:[%s258_s7] sm:$0xff] %v127_v29 }

</bundles_post_ra>
